<compile_context>
chip_gen: v6e
topology: v6e:2x2x1
jax: 0.10.0
libtpu: 0.0.40
codegen_flags: <defaults>
</compile_context>

<pallas_src>
import functools

import jax
import jax.numpy as jnp
from jax.experimental import pallas as pl
from jax.experimental.pallas import tpu as pltpu


# ----------------------------- Pallas kernel ------------------------------ #

def _moe_kernel(flags_ref, eff_e_ref, eff_j_ref,      # scalar prefetch (SMEM)
                x_ref, wgu_ref, wd_ref, wt_ref,       # VMEM input tiles
                o_ref,                                # output tile
                acc_ref):                             # f32 scratch accumulator
    i = pl.program_id(0)          # token block        ("parallel")
    e = pl.program_id(1)          # expert             ("arbitrary", reduction)
    j = pl.program_id(2)          # intermediate chunk ("arbitrary", reduction)
    num_e = pl.num_programs(1)
    num_j = pl.num_programs(2)

    @pl.when(jnp.logical_and(e == 0, j == 0))
    def _init():
        acc_ref[...] = jnp.zeros_like(acc_ref)

    active = flags_ref[i * num_e + e]   # any token in block i routed to expert e

    @pl.when(active != 0)
    def _compute():
        ti = wd_ref.shape[0]
        x = x_ref[...]                                                     # (tm, D) bf16
        # fused gate+up projection: one (tm, D) @ (D, 2*ti) MXU pass
        gu = jnp.dot(x, wgu_ref[...], preferred_element_type=jnp.float32)  # (tm, 2ti) f32
        g = gu[:, :ti]
        u = gu[:, ti:]
        h = (g * jax.nn.sigmoid(g)) * u                                    # SiLU(g)*u, f32
        y = jnp.dot(h.astype(wd_ref.dtype), wd_ref[...],
                    preferred_element_type=jnp.float32)                    # (tm, D) f32
        acc_ref[...] += wt_ref[...] * y     # wt_ref: (tm, 1) per-token expert weight

    @pl.when(jnp.logical_and(e == num_e - 1, j == num_j - 1))
    def _store():
        o_ref[...] = acc_ref[...].astype(o_ref.dtype)


# ---------------------------- tiling helpers ------------------------------ #

def _pick_tm(T):
    """Largest multiple-of-16 divisor of T, capped at 512 (bigger token tiles
    -> fewer expert-weight re-reads across token blocks)."""
    best = None
    for d in range(16, min(512, T) + 1, 16):
        if T % d == 0:
            best = d
    return best if best is not None else T


def _pick_ti(I):
    """Largest multiple-of-128 divisor of I, capped at 512 (keeps a single
    double-buffered weight chunk well under v7x's 64 MiB VMEM)."""
    best = None
    for d in range(128, min(512, I) + 1, 128):
        if I % d == 0:
            best = d
    return best if best is not None else I


def _vmem_estimate_bytes(tm, D, ti, out_itemsize):
    dbl = 2  # double buffering
    x_b = tm * D * 2 * dbl
    wgu_b = D * 2 * ti * 2 * dbl
    wd_b = ti * D * 2 * dbl
    wt_b = tm * 128 * 4 * dbl          # (tm,1) f32 tile, lane-padded
    o_b = tm * D * out_itemsize * dbl
    acc_b = tm * D * 4
    tmp = tm * 2 * ti * 4 + 2 * tm * ti * 4 + tm * D * 4
    return x_b + wgu_b + wd_b + wt_b + o_b + acc_b + tmp


# ------------------------------ MoE wrapper -------------------------------- #

def moe_forward(x2d, wgu, wd, token_weights, *, tm=None):
    """x2d: (T, D); wgu: (E, ni, D, 2*ti); wd: (E, ni, ti, D); token_weights: (T, E)."""
    T, D = x2d.shape
    E, ni, _, two_ti = wgu.shape
    ti = two_ti // 2
    if tm is None:
        tm = _pick_tm(T)
    assert T % tm == 0
    nb = T // tm

    x_bf = x2d.astype(jnp.bfloat16)
    wt = token_weights.astype(jnp.float32)                  # (T, E)
    wt_blocks = wt.reshape(nb, tm, E)
    wt_cols = wt_blocks.transpose(0, 2, 1)[..., None]        # (nb, E, tm, 1)

    # per-(token_block, expert) activity flags -> SMEM via scalar prefetch
    flags2d = jnp.any(wt_blocks != 0.0, axis=1)               # (nb, E) bool
    flags = flags2d.astype(jnp.int32).reshape(-1)             # (nb*E,)

    # "Effective" weight-block indices per grid step: when an expert is
    # inactive, hold the previous step's (expert, chunk) index so Pallas
    # skips the weight DMA entirely (block index unchanged -> no copy).
    fsteps = jnp.repeat(flags2d.reshape(-1), ni)                               # (nb*E*ni,)
    e_steps = jnp.tile(jnp.repeat(jnp.arange(E, dtype=jnp.int32), ni), nb)
    j_steps = jnp.tile(jnp.arange(ni, dtype=jnp.int32), nb * E)

    def scan_fn(carry, xs):
        ce, cj = carry
        f, es, js = xs
        ne = jnp.where(f, es, ce)
        nj = jnp.where(f, js, cj)
        return (ne, nj), (ne, nj)

    _, (eff_e, eff_j) = jax.lax.scan(
        scan_fn, (jnp.int32(0), jnp.int32(0)), (fsteps, e_steps, j_steps))

    def weight_map(i, e, j, flg, efe, efj):
        s = (i * E + e) * ni + j
        return (efe[s], efj[s], 0, 0)

    cp_kwargs = dict(dimension_semantics=("parallel", "arbitrary", "arbitrary"))
    est = _vmem_estimate_bytes(tm, D, ti, jnp.dtype(x2d.dtype).itemsize)
    if est > 12 * 1024 * 1024:
        # cap at 40 MiB so the same config stays safe on v7x's 64 MiB VMEM
        # TODO(synk): raise toward ~96 MiB on v6e/v5e for deeper weight buffering.
        cp_kwargs["vmem_limit_bytes"] = min(int(1.5 * est), 40 * 1024 * 1024)

    out = pl.pallas_call(
        _moe_kernel,
        out_shape=jax.ShapeDtypeStruct((T, D), x2d.dtype),
        grid_spec=pltpu.PrefetchScalarGridSpec(
            num_scalar_prefetch=3,
            grid=(nb, E, ni),
            in_specs=[
                pl.BlockSpec((tm, D), lambda i, e, j, *_: (i, 0)),          # x (resident)
                pl.BlockSpec((None, None, D, 2 * ti), weight_map),          # fused gate|up
                pl.BlockSpec((None, None, ti, D), weight_map),              # down
                pl.BlockSpec((None, None, tm, 1),
                             lambda i, e, j, *_: (i, e, 0, 0)),             # per-token weight
            ],
            out_specs=pl.BlockSpec((tm, D), lambda i, e, j, *_: (i, 0)),
            scratch_shapes=[pltpu.VMEM((tm, D), jnp.float32)],              # f32 accumulator
        ),
        compiler_params=pltpu.CompilerParams(**cp_kwargs),
    )(flags, eff_e, eff_j, x_bf, wgu, wd, wt_cols)
    return out


# ------------------------------ JAX glue ---------------------------------- #

def init_params(key, dim, intermediate_dim, num_shared, num_routed):
    def linear_w(k, out_f, in_f):
        bound = 1.0 / jnp.sqrt(in_f)
        return jax.random.uniform(k, (out_f, in_f), jnp.float32, -bound, bound)

    keys = jax.random.split(key, 3 * (num_shared + num_routed) + 2)
    p = {}
    i = 0

    def expert_stack(n):
        nonlocal i
        wg, wu, wd = [], [], []
        for _ in range(n):
            wg.append(linear_w(keys[i + 0], intermediate_dim, dim))
            wu.append(linear_w(keys[i + 1], intermediate_dim, dim))
            wd.append(linear_w(keys[i + 2], dim, intermediate_dim))
            i += 3
        return jnp.stack(wg), jnp.stack(wu), jnp.stack(wd)

    p["shared_wg"], p["shared_wu"], p["shared_wd"] = expert_stack(num_shared)
    p["routed_wg"], p["routed_wu"], p["routed_wd"] = expert_stack(num_routed)
    p["routing_w"] = linear_w(keys[i], num_routed, dim)
    p["routing_b"] = jax.random.uniform(
        keys[i + 1], (num_routed,), jnp.float32,
        -1.0 / jnp.sqrt(dim), 1.0 / jnp.sqrt(dim))
    p["routing_bias"] = jnp.zeros((num_routed,), jnp.float32)  # nn.Parameter(zeros)
    return p


def prepare_params(params, *, ti=None):
    """One-time weight relayout (stack shared+routed, pre-transpose, fuse
    gate|up, chunk the intermediate dim, cast to bf16). Keeps the per-call
    forward free of full-weight-set reshapes/casts."""
    wg = jnp.concatenate([params["shared_wg"], params["routed_wg"]], axis=0)  # (E, I, D)
    wu = jnp.concatenate([params["shared_wu"], params["routed_wu"]], axis=0)  # (E, I, D)
    wd = jnp.concatenate([params["shared_wd"], params["routed_wd"]], axis=0)  # (E, D, I)
    E, I, D = wg.shape
    if ti is None:
        ti = _pick_ti(I)
    ni = I // ti
    wg_t = wg.transpose(0, 2, 1).reshape(E, D, ni, ti)
    wu_t = wu.transpose(0, 2, 1).reshape(E, D, ni, ti)
    wgu = jnp.concatenate([wg_t, wu_t], axis=-1).transpose(0, 2, 1, 3)  # (E, ni, D, 2ti)
    wd_t = wd.transpose(0, 2, 1).reshape(E, ni, ti, D)                  # (E, ni, ti, D)
    return {
        "wgu": wgu.astype(jnp.bfloat16),
        "wd": wd_t.astype(jnp.bfloat16),
        "routing_w": params["routing_w"],
        "routing_b": params["routing_b"],
        "routing_bias": params["routing_bias"],
    }


@functools.partial(jax.jit, static_argnames=("top_k",))
def deepseek_ffn_forward(prepared, x, top_k):
    """Equivalent of DeepSeekFFN.forward(x, update_bias=False)."""
    B, S, D = x.shape
    T = B * S
    x2d = x.reshape(T, D)
    R = prepared["routing_w"].shape[0]
    E = prepared["wgu"].shape[0]
    n_shared = E - R

    # --- routing (tiny; plain JAX glue) ---
    logits = (x2d @ prepared["routing_w"].T
              + prepared["routing_b"] + prepared["routing_bias"])
    probs = jax.nn.sigmoid(logits)
    top_v, top_i = jax.lax.top_k(probs, top_k)
    top_v = top_v / jnp.sum(top_v, axis=-1, keepdims=True)

    routed_w = jnp.zeros((T, R), dtype=jnp.float32)
    for k in range(top_k):
        routed_w = routed_w + jax.nn.one_hot(top_i[:, k], R, dtype=jnp.float32) * top_v[:, k:k + 1]

    shared_scale = 1.0 if n_shared == 1 else 1.0 / n_shared
    shared_w = jnp.full((T, n_shared), shared_scale, dtype=jnp.float32)
    token_w = jnp.concatenate([shared_w, routed_w], axis=1)  # (T, E)

    out2d = moe_forward(x2d, prepared["wgu"], prepared["wd"], token_w)
    return out2d.reshape(B, S, D)
    # TODO(synk): update_bias=True path (expert_load-driven routing_bias update) is
    # host-side parameter mutation, not a kernel concern; omitted.


def deepseek_ffn_reference(params, x, top_k):
    """Pure-JAX f32 reference mirroring the PyTorch forward."""
    B, S, D = x.shape
    x2d = x.reshape(B * S, D)

    def expert(xi, wg, wu, wd):
        g = xi @ wg.T
        u = xi @ wu.T
        return (jax.nn.silu(g) * u) @ wd.T

    n_shared = params["shared_wg"].shape[0]
    shared = sum(expert(x2d, params["shared_wg"][s], params["shared_wu"][s],
                        params["shared_wd"][s]) for s in range(n_shared))
    if n_shared > 1:
        shared = shared / n_shared

    R = params["routed_wg"].shape[0]
    logits = x2d @ params["routing_w"].T + params["routing_b"] + params["routing_bias"]
    probs = jax.nn.sigmoid(logits)
    top_v, top_i = jax.lax.top_k(probs, top_k)
    top_v = top_v / jnp.sum(top_v, axis=-1, keepdims=True)

    routed = jnp.zeros_like(x2d)
    for k in range(top_k):
        for e in range(R):
            mask = (top_i[:, k] == e).astype(x.dtype)[:, None]
            y = expert(x2d, params["routed_wg"][e], params["routed_wu"][e],
                       params["routed_wd"][e])
            routed = routed + mask * top_v[:, k:k + 1] * y
    return (shared + routed).reshape(B, S, D)


if __name__ == "__main__":
    # config: nn_embed=32, ffn_intermediate_size=64, num_experts=4,
    #         num_shared_experts=1, experts_top_k=2
    DIM, INTER = 32, 64
    NUM_EXPERTS, NUM_SHARED, TOP_K = 4, 1, 2
    NUM_ROUTED = NUM_EXPERTS - NUM_SHARED
    B, SEQ = 2, 8

    key = jax.random.PRNGKey(0)
    kp, kx = jax.random.split(key)
    params = init_params(kp, DIM, INTER, NUM_SHARED, NUM_ROUTED)
    x = jax.random.normal(kx, (B, SEQ, DIM), jnp.float32)

    prepared = prepare_params(params)                 # one-time weight relayout/cast
    prepared = jax.block_until_ready(prepared)

    out = deepseek_ffn_forward(prepared, x, TOP_K)
    out = jax.block_until_ready(out)

    ref = deepseek_ffn_reference(params, x, TOP_K)
    assert out.shape == (B, SEQ, DIM)
    # bf16 MXU operands => slightly looser tolerance than the pure-f32 reference
    assert jnp.allclose(out, ref, rtol=5e-2, atol=5e-2), "mismatch vs reference"
    print("KERNEL_OK")
</pallas_src>

<mosaic_0001>
module attributes {stable_mosaic.version = 11 : i64} {
  func.func @_moe_kernel(%arg0: i32, %arg1: i32, %arg2: i32, %arg3: memref<4xi32, #tpu.memory_space<smem>>, %arg4: memref<4xi32, #tpu.memory_space<smem>>, %arg5: memref<4xi32, #tpu.memory_space<smem>>, %arg6: memref<16x32xbf16, #tpu.memory_space<vmem>>, %arg7: memref<1x1x32x128xbf16, #tpu.memory_space<vmem>>, %arg8: memref<1x1x64x32xbf16, #tpu.memory_space<vmem>>, %arg9: memref<1x1x16x1xf32, #tpu.memory_space<vmem>>, %arg10: memref<16x32xf32, #tpu.memory_space<vmem>>, %arg11: memref<16x32xf32, #tpu.memory_space<vmem>>) attributes {dimension_semantics = [#tpu.dimension_semantics<parallel>, #tpu.dimension_semantics<arbitrary>, #tpu.dimension_semantics<arbitrary>], iteration_bounds = array<i64: 1, 4, 1>, scalar_prefetch = 3 : i64, scratch_operands = 1 : i64, tpu.core_type = #tpu.core_type<tc>, window_params = [{transform_indices = @transform_0, window_bounds = array<i64: 16, 32>}, {transform_indices = @transform_1, window_bounds = array<i64: 1, 1, 32, 128>}, {transform_indices = @transform_2, window_bounds = array<i64: 1, 1, 64, 32>}, {transform_indices = @transform_3, window_bounds = array<i64: 1, 1, 16, 1>}, {transform_indices = @transform_4, window_bounds = array<i64: 16, 32>}]} {
    %c0_i32 = arith.constant 0 : i32
    %0 = arith.cmpi eq, %arg1, %c0_i32 : i32
    %c0_i32_0 = arith.constant 0 : i32
    %1 = arith.cmpi eq, %arg2, %c0_i32_0 : i32
    %2 = arith.andi %0, %1 : i1
    %3 = arith.extui %2 : i1 to i32
    %c0_i32_1 = arith.constant 0 : i32
    %4 = arith.cmpi ne, %3, %c0_i32_1 : i32
    scf.if %4 {
      %cst = arith.constant 0.000000e+00 : f32
      %17 = vector.broadcast %cst : f32 to vector<16x32xf32>
      %c0 = arith.constant 0 : index
      %c0_6 = arith.constant 0 : index
      %18 = vector.load %arg11[%c0, %c0_6] : memref<16x32xf32, #tpu.memory_space<vmem>>, vector<16x32xf32>
      tpu.vector_store %arg11[%c0, %c0_6], %17 {strides = array<i32>} : memref<16x32xf32, #tpu.memory_space<vmem>>, vector<16x32xf32>,
    } else {
    }
    %c4_i32 = arith.constant 4 : i32
    %5 = arith.muli %arg0, %c4_i32 : i32
    %6 = arith.addi %5, %arg1 : i32
    %7 = arith.index_cast %6 : i32 to index
    %8 = memref.load %arg3[%7] : memref<4xi32, #tpu.memory_space<smem>>
    %c0_i32_2 = arith.constant 0 : i32
    %9 = arith.cmpi ne, %8, %c0_i32_2 : i32
    %10 = arith.extui %9 : i1 to i32
    %c0_i32_3 = arith.constant 0 : i32
    %11 = arith.cmpi ne, %10, %c0_i32_3 : i32
    scf.if %11 {
      %c0 = arith.constant 0 : index
      %c0_6 = arith.constant 0 : index
      %17 = vector.load %arg6[%c0, %c0_6] : memref<16x32xbf16, #tpu.memory_space<vmem>>, vector<16x32xbf16>
      %c0_7 = arith.constant 0 : index
      %c0_8 = arith.constant 0 : index
      %c0_9 = arith.constant 0 : index
      %c0_10 = arith.constant 0 : index
      %18 = vector.load %arg7[%c0_7, %c0_8, %c0_9, %c0_10] : memref<1x1x32x128xbf16, #tpu.memory_space<vmem>>, vector<1x1x32x128xbf16>
      %19 = vector.shape_cast %18 : vector<1x1x32x128xbf16> to vector<32x128xbf16>
      %cst = arith.constant dense<0.000000e+00> : vector<16x128xf32>
      %20 = tpu.matmul %17, %19, %cst {dimension_numbers = #tpu.dot_dimension_numbers<[1], [0], [0], [1], [0, 0, 1, 1], [], []>} : vector<16x32xbf16>, vector<32x128xbf16>, vector<16x128xf32> -> vector<16x128xf32>
      %21 = vector.extract_strided_slice %20 {offsets = [0, 0], sizes = [16, 64], strides = [1, 1]} : vector<16x128xf32> to vector<16x64xf32>
      %22 = vector.extract_strided_slice %20 {offsets = [0, 64], sizes = [16, 64], strides = [1, 1]} : vector<16x128xf32> to vector<16x64xf32>
      %23 = arith.negf %21 : vector<16x64xf32>
      %24 = math.exp %23 : vector<16x64xf32>
      %cst_11 = arith.constant 1.000000e+00 : f32
      %25 = vector.broadcast %cst_11 : f32 to vector<16x64xf32>
      %26 = arith.addf %25, %24 : vector<16x64xf32>
      %27 = arith.divf %25, %26 : vector<16x64xf32>
      %28 = arith.mulf %21, %27 : vector<16x64xf32>
      %29 = arith.mulf %28, %22 : vector<16x64xf32>
      %30 = arith.truncf %29 : vector<16x64xf32> to vector<16x64xbf16>
      %c0_12 = arith.constant 0 : index
      %c0_13 = arith.constant 0 : index
      %c0_14 = arith.constant 0 : index
      %c0_15 = arith.constant 0 : index
      %31 = vector.load %arg8[%c0_12, %c0_13, %c0_14, %c0_15] : memref<1x1x64x32xbf16, #tpu.memory_space<vmem>>, vector<1x1x64x32xbf16>
      %32 = vector.shape_cast %31 : vector<1x1x64x32xbf16> to vector<64x32xbf16>
      %cst_16 = arith.constant dense<0.000000e+00> : vector<16x32xf32>
      %33 = tpu.matmul %30, %32, %cst_16 {dimension_numbers = #tpu.dot_dimension_numbers<[1], [0], [0], [1], [0, 0, 1, 1], [], []>} : vector<16x64xbf16>, vector<64x32xbf16>, vector<16x32xf32> -> vector<16x32xf32>
      %c0_17 = arith.constant 0 : index
      %c0_18 = arith.constant 0 : index
      %34 = vector.load %arg11[%c0_17, %c0_18] : memref<16x32xf32, #tpu.memory_space<vmem>>, vector<16x32xf32>
      %c0_19 = arith.constant 0 : index
      %c0_20 = arith.constant 0 : index
      %c0_21 = arith.constant 0 : index
      %c0_22 = arith.constant 0 : index
      %35 = vector.load %arg9[%c0_19, %c0_20, %c0_21, %c0_22] : memref<1x1x16x1xf32, #tpu.memory_space<vmem>>, vector<1x1x16x1xf32>
      %36 = vector.shape_cast %35 : vector<1x1x16x1xf32> to vector<16x1xf32>
      %37 = vector.broadcast %36 : vector<16x1xf32> to vector<16x32xf32>
      %38 = arith.mulf %37, %33 : vector<16x32xf32>
      %39 = arith.addf %34, %38 : vector<16x32xf32>
      %c0_23 = arith.constant 0 : index
      %c0_24 = arith.constant 0 : index
      %40 = vector.load %arg11[%c0_23, %c0_24] : memref<16x32xf32, #tpu.memory_space<vmem>>, vector<16x32xf32>
      tpu.vector_store %arg11[%c0_23, %c0_24], %39 {strides = array<i32>} : memref<16x32xf32, #tpu.memory_space<vmem>>, vector<16x32xf32>,
    } else {
    }
    %c3_i32 = arith.constant 3 : i32
    %12 = arith.cmpi eq, %arg1, %c3_i32 : i32
    %c0_i32_4 = arith.constant 0 : i32
    %13 = arith.cmpi eq, %arg2, %c0_i32_4 : i32
    %14 = arith.andi %12, %13 : i1
    %15 = arith.extui %14 : i1 to i32
    %c0_i32_5 = arith.constant 0 : i32
    %16 = arith.cmpi ne, %15, %c0_i32_5 : i32
    scf.if %16 {
      %c0 = arith.constant 0 : index
      %c0_6 = arith.constant 0 : index
      %17 = vector.load %arg11[%c0, %c0_6] : memref<16x32xf32, #tpu.memory_space<vmem>>, vector<16x32xf32>
      %c0_7 = arith.constant 0 : index
      %c0_8 = arith.constant 0 : index
      %18 = vector.load %arg10[%c0_7, %c0_8] : memref<16x32xf32, #tpu.memory_space<vmem>>, vector<16x32xf32>
      tpu.vector_store %arg10[%c0_7, %c0_8], %17 {strides = array<i32>} : memref<16x32xf32, #tpu.memory_space<vmem>>, vector<16x32xf32>,
    } else {
    }
    return
  }
  func.func @transform_0(%arg0: i32, %arg1: i32, %arg2: i32, %arg3: memref<4xi32, #tpu.memory_space<smem>>, %arg4: memref<4xi32, #tpu.memory_space<smem>>, %arg5: memref<4xi32, #tpu.memory_space<smem>>) -> (i32, i32) {
    %c0_i32 = arith.constant 0 : i32
    %c0_i32_0 = arith.constant 0 : i32
    return %arg0, %c0_i32 : i32, i32
  }
  func.func @transform_1(%arg0: i32, %arg1: i32, %arg2: i32, %arg3: memref<4xi32, #tpu.memory_space<smem>>, %arg4: memref<4xi32, #tpu.memory_space<smem>>, %arg5: memref<4xi32, #tpu.memory_space<smem>>) -> (i32, i32, i32, i32) {
    %c4_i32 = arith.constant 4 : i32
    %0 = arith.muli %arg0, %c4_i32 : i32
    %1 = arith.addi %0, %arg1 : i32
    %c1_i32 = arith.constant 1 : i32
    %2 = arith.muli %1, %c1_i32 : i32
    %3 = arith.addi %2, %arg2 : i32
    %4 = arith.index_cast %3 : i32 to index
    %5 = memref.load %arg4[%4] : memref<4xi32, #tpu.memory_space<smem>>
    %6 = arith.index_cast %3 : i32 to index
    %7 = memref.load %arg5[%6] : memref<4xi32, #tpu.memory_space<smem>>
    %c0_i32 = arith.constant 0 : i32
    %c0_i32_0 = arith.constant 0 : i32
    %c0_i32_1 = arith.constant 0 : i32
    return %5, %7, %c0_i32, %c0_i32_0 : i32, i32, i32, i32
  }
  func.func @transform_2(%arg0: i32, %arg1: i32, %arg2: i32, %arg3: memref<4xi32, #tpu.memory_space<smem>>, %arg4: memref<4xi32, #tpu.memory_space<smem>>, %arg5: memref<4xi32, #tpu.memory_space<smem>>) -> (i32, i32, i32, i32) {
    %c4_i32 = arith.constant 4 : i32
    %0 = arith.muli %arg0, %c4_i32 : i32
    %1 = arith.addi %0, %arg1 : i32
    %c1_i32 = arith.constant 1 : i32
    %2 = arith.muli %1, %c1_i32 : i32
    %3 = arith.addi %2, %arg2 : i32
    %4 = arith.index_cast %3 : i32 to index
    %5 = memref.load %arg4[%4] : memref<4xi32, #tpu.memory_space<smem>>
    %6 = arith.index_cast %3 : i32 to index
    %7 = memref.load %arg5[%6] : memref<4xi32, #tpu.memory_space<smem>>
    %c0_i32 = arith.constant 0 : i32
    %c0_i32_0 = arith.constant 0 : i32
    %c0_i32_1 = arith.constant 0 : i32
    return %5, %7, %c0_i32, %c0_i32_0 : i32, i32, i32, i32
  }
  func.func @transform_3(%arg0: i32, %arg1: i32, %arg2: i32, %arg3: memref<4xi32, #tpu.memory_space<smem>>, %arg4: memref<4xi32, #tpu.memory_space<smem>>, %arg5: memref<4xi32, #tpu.memory_space<smem>>) -> (i32, i32, i32, i32) {
    %c0_i32 = arith.constant 0 : i32
    %c0_i32_0 = arith.constant 0 : i32
    %c0_i32_1 = arith.constant 0 : i32
    return %arg0, %arg1, %c0_i32, %c0_i32_0 : i32, i32, i32, i32
  }
  func.func @transform_4(%arg0: i32, %arg1: i32, %arg2: i32, %arg3: memref<4xi32, #tpu.memory_space<smem>>, %arg4: memref<4xi32, #tpu.memory_space<smem>>, %arg5: memref<4xi32, #tpu.memory_space<smem>>) -> (i32, i32) {
    %c0_i32 = arith.constant 0 : i32
    %c0_i32_0 = arith.constant 0 : i32
    return %arg0, %c0_i32 : i32, i32
  }
}

</mosaic_0001>

<bundles_post_ra>
// kernel: custom-call.1
= control target key start
LH: loop header
LB: loop body
LE: loop exit
PB: predicated region body
PF: predicated region fallthrough
CT: control target
= control target key end

     0   :  { %s6_s0 = inlined_call_operand.vmem [shape: s32[4], index: 0, kind: output, shape index: {}]  }

// kernel: deepseek_ffn_forward.1
= control target key start
LH: loop header
LB: loop body
LE: loop exit
PB: predicated region body
PF: predicated region fallthrough
CT: control target
= control target key end

     0   :  { %s1101_s0 = inlined_call_operand.vmem [shape: s32[4], index: 0, kind: input, shape index: {}]   ;;  %s1102_s3 = inlined_call_operand.vmem [shape: bf16[16,32], index: 3, kind: input, shape index: {}]   ;;  %s1103_s4 = inlined_call_operand.vmem [shape: bf16[4,1,32,128], index: 4, kind: input, shape index: {}]   ;;  %s1104_s5 = inlined_call_operand.vmem [shape: bf16[4,1,64,32], index: 5, kind: input, shape index: {}]   ;;  %s1105_s6 = inlined_call_operand.vmem [shape: f32[1,4,16,1], index: 6, kind: input, shape index: {}]   ;;  %s1106_s7 = inlined_call_operand.hbm [shape: f32[16,32], index: 7, kind: output, shape index: {}]   ;;  %s1107_s1 = inlined_call_operand.vmem [shape: s32[4], index: 1, kind: input, shape index: {}]   ;;  %s1108_s2 = inlined_call_operand.vmem [shape: s32[4], index: 2, kind: input, shape index: {}]  }
   0x1   :  { %s12_s26 = sshll.u32 %s1101_s0, 4  ;;  %s16_s29 = sshll.u32 %s1107_s1, 4  ;;  %s13_s26 = int_to_ptr.vmem [resolvable:$true] %s12_s26  ;;  %s17_s29 = int_to_ptr.vmem [resolvable:$true] %s16_s29 }
   0x2   :  { %s868_s30 = scalar_lea.vmem %s13_s26, 16  ;;  %p873_p1 = scmp.lt.s32.totalorder %s13_s26, %s13_s26 }
   0x3   :  { %p869_p0 = scmp.ne.s32.totalorder %s13_s26, %s868_s30  ;;  %p874_p2 = scmp.lt.s32.totalorder %s868_s30, %s868_s30 }
   0x5   :  { %p875_p3 = por %p874_p2, %p873_p1 }
   0x7   :  { %p876_p4 = pnand %p875_p3, %p869_p0 }
   0x9   :  { %879 = shalt.err (!%p876_p4)  }
   0xa   :  { %s958_s8 = smov [#allocation4]   ;;  %s880_s9 = scalar_lea.vmem %s17_s29, 16 }
   0xb   :  { %15 = dma.vmem_to_smem %s13_s26, 16, %s958_s8, [#allocation3] }
   0xc   :  { %p881_p5 = scmp.ne.s32.totalorder %s17_s29, %s880_s9  ;;  %p885_p6 = scmp.lt.s32.totalorder %s17_s29, %s17_s29 }
   0xd   :  { %p886_p7 = scmp.lt.s32.totalorder %s880_s9, %s880_s9 }
   0xf   :  { %p887_p8 = por %p886_p7, %p885_p6 }
  0x11   :  { %p888_p9 = pnand %p887_p8, %p881_p5 }
  0x13   :  { %891 = shalt.err (!%p888_p9)  }
  0x14   :  { %s959_s0 = smov [#allocation5]   ;;  %s20_s11 = sshll.u32 %s1108_s2, 4  ;;  %s21_s11 = int_to_ptr.vmem [resolvable:$true] %s20_s11 }
  0x15   :  { %19 = dma.vmem_to_smem %s17_s29, 16, %s959_s0, [#allocation3] }
  0x16   :  { %s892_s12 = scalar_lea.vmem %s21_s11, 16  ;;  %p897_p11 = scmp.lt.s32.totalorder %s21_s11, %s21_s11 }
  0x17   :  { %p893_p10 = scmp.ne.s32.totalorder %s21_s11, %s892_s12  ;;  %p898_p12 = scmp.lt.s32.totalorder %s892_s12, %s892_s12 }
  0x19   :  { %p899_p13 = por %p898_p12, %p897_p11 }
  0x1b   :  { %p900_p0 = pnand %p899_p13, %p893_p10 }
  0x1d   :  { %903 = shalt.err (!%p900_p0)  }
  0x1e   :  { %s960_s13 = smov [#allocation6]  }
  0x1f   :  { %23 = dma.vmem_to_smem %s21_s11, 16, %s960_s13, [#allocation3] }
  0x20   :  { %940 = dma.done.wait [#allocation3], 48 }
  0x21   :  { %941 = vsyncadd [#allocation3], 4294967248 }
  0x22   :  { %25 = sfence }
  0x23   :  { %26 = vsyncpa [#allocation8], 0  ;;  %s1018_s14 = smov 0   ;;  %s1020_s15 = smov 0  }
  0x24   :  { %s1022_s16 = smov 0  }
  0x25 LB: > { %s748_s2 = sadd.s32 4294967295, %s956_s16   ;;  %s47_s17 = sadd.s32 1, %s952_s15  ;;  %s956_s16 = sphi %s1022_s16, %s32_s16   ;;  %s952_s15 = sphi %s1020_s15, %s1111_s15   ;;  %s948_s14 = sphi %s1018_s14, %s1110_s14  }
  0x26   : > { %p49_p1 = scmp.ge.s32.totalorder %s47_s17, 4  ;;  %p752_p2 = scmp.ge.s32.totalorder %s956_s16, 1 }
  0x27   : > { %p288_p3 = scmp.lt.s32.totalorder %s956_s16, 5 }
  0x28   : > { %s1113_s17 = smov (%p49_p1, %s47_s17), 0 }
  0x29   : > { %p289_p4 = pnand %p752_p2, %p288_p3 }
  0x2a   : > { %s355_s18 = sld [smem:[#allocation5 + %s948_s14]] (!%p289_p4)  ;;  %p392_p5 = scmp.lt.s32.totalorder (!%p289_p4), %s948_s14, 3 }
  0x2b   : > { %292 = sbr.rel (%p289_p4) target bundleno = 626 (0x272), region = 36  ;;  %s356_s19 = sld [smem:[#allocation6 + %s948_s14]] (!%p289_p4) }
  0x2c   : > { %p401_p6 = scmp.eq.s32.totalorder (!%p289_p4), %s948_s14, 0  ;;  %s374_s20 = sld [smem:[#allocation5 + %s948_s14]] (!%p289_p4) }
  0x2d   : > { %s375_s21 = sld [smem:[#allocation6 + %s948_s14]] (!%p289_p4) }
  0x30   : > { %s393_s22 = scalar_select %p392_p5, %s948_s14, 3  ;;  %vm407_vm0 = vcmask (%p401_p6), 261120   ;;  %v961_v0 = vmov (%p401_p6), 0.0  }
  0x31   : > { %p357_p7 = scmp.lt.s32.totalorder %s355_s18, 3  ;;  %p359_p8 = scmp.lt.s32.totalorder %s356_s19, 0  ;;  %408 = vst.msk [vmem:[#allocation2] sm:$0xff] (%p401_p6), %vm407_vm0, %v961_v0  ;;  %409 = vst.msk [vmem:[#allocation2 + $0x8] sm:$0xff] (%p401_p6), %vm407_vm0, %v961_v0 }
  0x32   : > { %s779_s23 = sshll.u32 %s393_s22, 4  ;;  %p376_p9 = scmp.lt.s32.totalorder %s374_s20, 3 }
  0x33   : > { %s1049_s26 = scalar_lea.vmem %s1105_s6, %s779_s23  ;;  %s1115_s18 = smov (!%p357_p7, %s355_s18), 3 }
  0x34   : > { %s1117_s19 = smov (!%p359_p8, %s356_s19), 0  ;;  %s754_s27 = sshll.u32 %s1115_s18, 2 }
  0x35   : > { %s753_s28 = sshll.u32 %s1117_s19, 2  ;;  %p378_p10 = scmp.lt.s32.totalorder %s375_s21, 0 }
  0x36   : > { %s363_s29 = sadd.s32 %s754_s27, %s753_s28  ;;  %s1119_s20 = smov (!%p376_p9, %s374_s20), 3 }
  0x37   : > { %s755_s30 = sshll.u32 %s363_s29, 2  ;;  %s1121_s21 = smov (!%p378_p10, %s375_s21), 0 }
  0x38   : > { %s365_s0 = scalar_lea.vmem %s1103_s4, %s755_s30  ;;  %s757_s1 = sshll.u32 %s1119_s20, 3 }
  0x39   : > { %s756_s10 = sshll.u32 %s1121_s21, 3  ;;  %406 = sbr.rel (!%p401_p6) target bundleno = 62 (0x3e), region = 40 }
  0x3a   : > { %s382_s11 = sadd.s32 %s757_s1, %s756_s10 }
  0x3b   : > { %s758_s12 = sshll.u32 %s382_s11, 2 }
  0x3c   : > { %s1057_s23 = scalar_lea.vmem %s1104_s5, %s758_s12 }
  0x3e PF: > { %s412_s18 = sld [smem:[#allocation4 + %s948_s14]] }
  0x44   : > { %p762_p11 = scmp.eq.s32.totalorder %s412_s18, 0 }
  0x45   : > { %s965_s21 = smov (!%p762_p11), 64  }
  0x46   : > { %416 = sbr.rel (%p762_p11) target bundleno = 602 (0x25a), region = 44 }
  0x4b   : > { %v853_v1 = vld [vmem:[%s365_s0 + $0x8] sm:$0xff]   ;;  %v962_v2 = vmov 0.0   ;;  %v854_v3 = vld [vmem:[%s365_s0] sm:$0xff]   ;;  %vm963_vm1 = vmmov 0   ;;  %vm440_vm2 = vcmask 261120   ;;  %v856_v5 = vld [vmem:[%s1057_s23 + $0x18] sm:$0xff]  }
  0x4c   : > { %790 = vmatprep.subr.bf16.mxu0 %v962_v2  ;;  %798 = vmatprep.subr.bf16.mxu1 %v962_v2  ;;  %v855_v4 = vld [vmem:[%s1102_s3] sm:$0xff]   ;;  %v857_v6 = vld [vmem:[%s1057_s23 + $0x10] sm:$0xff]   ;;  %v858_v7 = vld [vmem:[%s1057_s23 + $0x8] sm:$0xff]   ;;  %v964_v10 = vmov 0   ;;  %vm542_vm3 = vcmask 523264  }
  0x4d   : > { %791 = vmatpush3.bf16.msra.mxu0 %v853_v1  ;;  %794 = vmatprep.mubr.msk.bf16.mxu0 %vm963_vm1, %v962_v2  ;;  %v859_v8 = vld [vmem:[%s1057_s23] sm:$0xff]   ;;  %v590_v11 = vld [vmem:[%s1049_s26 + $0x8] sm:$0xff] }
  0x4e   : > { %792 = vmatprep.subr.bf16.mxu0 %v962_v2  ;;  %806 = vmatprep.mubr.msk.bf16.mxu1 %vm963_vm1, %v962_v2  ;;  %v589_v9 = vld [vmem:[%s1049_s26] sm:$0xff]  ;;  %v588_v39 = vld [vmem:[#allocation2 + $0x8] sm:$0xff] }
  0x4f   : > { %799 = vmatpush3.bf16.msra.mxu1 %v856_v5  ;;  %851 = vset.pattern.permute.xlu1 %v964_v10  ;;  %v587_v33 = vld [vmem:[#allocation2] sm:$0xff] }
  0x50   : > { %800 = vmatprep.subr.bf16.mxu1 %v962_v2  ;;  %852 = vset.pattern.permute.xlu0 %v964_v10 }
  0x51   : > { %793 = vmatpush3.bf16.msra.mxu0 %v854_v3  ;;  %593 = vperm.xlu1 %851, %v589_v9  }
  0x53   : > { %801 = vmatpush3.bf16.msra.mxu1 %v857_v6 }
  0x54   : > { %795 = vmatmul.mubr.msk.bf16.vlgmr.msra.gmra.mxu0 %vm440_vm2, %v855_v4  ;;  %802 = vmatprep.subr.bf16.mxu1 %v962_v2 }
  0x55   : > { %598 = vperm.xlu1 %851, %v590_v11  }
  0x57   : > { %803 = vmatpush3.bf16.msra.mxu1 %v858_v7 }
  0x58   : > { %804 = vmatprep.subr.bf16.mxu1 %v962_v2 }
  0x5b   : > { %805 = vmatpush3.bf16.msra.mxu1 %v859_v8 }
  0xcc   : > { %v594_v31 = vpop.permute.xlu1 %593 }
  0xd0   : > { %v599_v37 = vpop.permute.xlu1 %598 }
 0x114   : > { %v478_v12 = vpop.f32.mrf.mxu0 }
 0x115   : > { %501 = vrot.lane.b32.xlu0 %v478_v12, %s965_s21  ;;  %v767_v16 = vmul.f32 -1.442695, %v478_v12 }
 0x116   : > { %v796_v13 = vpop.f32.mrf.mxu0 }
 0x117   : > { %860 = vpow2.f32 %v767_v16 }
 0x118   : > { %v481_v14 = vpop.f32.mrf.mxu0 }
 0x119   : > { %503 = vrot.lane.b32.xlu0 %v481_v14, %s965_s21  ;;  %v768_v17 = vmul.f32 -1.442695, %v481_v14 }
 0x11a   : > { %v797_v15 = vpop.f32.mrf.mxu0 }
 0x11b   : > { %862 = vpow2.f32 %v768_v17 }
 0x124   : > { %v861_v18 = vpop.eup %860 }
 0x125   : > { %v491_v20 = vadd.f32 1.0, %v861_v18 }
 0x127   : > { %864 = vrcp.f32 %v491_v20 }
 0x128   : > { %v863_v19 = vpop.eup %862 }
 0x129   : > { %v492_v21 = vadd.f32 1.0, %v863_v19 }
 0x12b   : > { %866 = vrcp.f32 %v492_v21 }
 0x134   : > { %v865_v22 = vpop.eup %864 }
 0x135   : > { %v497_v25 = vmul.f32 %v865_v22, %v478_v12 }
 0x138   : > { %v867_v23 = vpop.eup %866 }
 0x139   : > { %v498_v26 = vmul.f32 %v867_v23, %v481_v14 }
 0x187   : > { %v502_v24 = vpop.permute.xlu0 %501 }
 0x188   : > { %v507_v28 = vmul.f32 %v502_v24, %v497_v25 }
 0x18b   : > { %v504_v27 = vpop.permute.xlu0 %503 }
 0x18c   : > { %v508_v29 = vmul.f32 %v504_v27, %v498_v26 }
 0x18e   : > { %v509_v30 = vpack.c.bf16 %v508_v29, %v507_v28 }
 0x190   : > { %807 = vmatmul.mubr.msk.bf16.vlgmr.msra.gmra.mxu1 %vm542_vm3, %v509_v30 }
 0x250   : > { %v580_v32 = vpop.f32.mrf.mxu1 }
 0x251   : > { %v601_v34 = vmul.f32 %v594_v31, %v580_v32 }
 0x252   : > { %v808_v35 = vpop.f32.mrf.mxu1 }
 0x253   : > { %v603_v36 = vadd.f32 %v601_v34, %v587_v33 }
 0x254   : > { %v583_v38 = vpop.f32.mrf.mxu1 }
 0x255   : > { %605 = vst.msk [vmem:[#allocation2] sm:$0xff] %vm440_vm2, %v603_v36  ;;  %v602_v40 = vmul.f32 %v599_v37, %v583_v38 }
 0x256   : > { %v809_v41 = vpop.f32.mrf.mxu1 }
 0x257   : > { %v604_v42 = vadd.f32 %v602_v40, %v588_v39 }
 0x259   : > { %606 = vst.msk [vmem:[#allocation2 + $0x8] sm:$0xff] %vm440_vm2, %v604_v42 }
 0x25a PF: > { %p607_p12 = scmp.eq.s32.totalorder %s948_s14, 3 }
 0x25b   : > { %vm614_vm4 = vcmask (%p607_p12), 261120  }
 0x25c   : > { %611 = sbr.rel (!%p607_p12) target bundleno = 610 (0x262), region = 48  ;;  %v612_v43 = vld [vmem:[#allocation2] sm:$0xff] (%p607_p12) }
 0x25d   : > { %615 = vst.msk [vmem:[#allocation7] sm:$0xff] (%p607_p12), %vm614_vm4, %v612_v43 }
 0x260   : > { %v613_v44 = vld [vmem:[#allocation2 + $0x8] sm:$0xff] (%p607_p12) }
 0x261   : > { %616 = vst.msk [vmem:[#allocation7 + $0x8] sm:$0xff] %vm614_vm4, %v613_v44 }
 0x262 PF: > { %p1077_p13 = scmp.eq.s32.totalorder %s748_s2, 3  ;;  %s966_s25 = smov [#allocation7]  }
 0x263   : > { %s626_s26 = sshll.u32 %s966_s25, 4  ;;  %s627_s26 = int_to_ptr.vmem [resolvable:$true] %s626_s26 }
 0x264   : > { %s904_s27 = scalar_lea.vmem %s627_s26, 256  ;;  %p911_p3 = scmp.lt.s32.totalorder %s627_s26, %s627_s26 }
 0x265   : > { %p905_p0 = scmp.ne.s32.totalorder %s627_s26, %s904_s27  ;;  %p912_p4 = scmp.lt.s32.totalorder %s904_s27, %s904_s27 }
 0x267   : > { %p906_p1 = pnand %p905_p0, %p1077_p13  ;;  %p913_p5 = por %p912_p4, %p911_p3 }
 0x269   : > { %p907_p2 = pneg %p906_p1 }
 0x26b   : > { %p914_p6 = pnand %p913_p5, %p907_p2 }
 0x26d   : > { %917 = shalt.err (!%p914_p6)
}
 0x26e   : > { %s967_s14 = smov 128   ;;  %s968_s2 = smov 8  }
 0x26f   : > { %811 = dma.vmem_to_hbm [thread:$0]  (%p1077_p13), %s627_s26, 256, %s1106_s7, [#allocation8], %s967_s14, %s967_s14, %s968_s2  }
 0x270   : > { %943 = dma.done.wait (%p1077_p13), [#allocation8], 256  }
 0x271   : > { %945 = vsyncadd (%p1077_p13), [#allocation8], 4294967040 }
 0x272 PF: > { %s32_s16 = sadd.s32 1, %s956_s16   ;;  %s1110_s14 = smov %s952_s15 }
 0x273   : > { %p29_p7 = scmp.ge.s32.totalorder %s32_s16, 6   ;;  %s1111_s15 = smov %s1113_s17 }
 0x275   :  { %31 = sbr.rel (!%p29_p7) target bundleno = 37 (0x25), region = 85 }
 0x27a   :  { %642 = vsyncpa [#allocation8], 1 }
 0x27b   :  { %644 = vsyncpa [#allocation8 + $0x1], 1 }

</bundles_post_ra>
